<compile_context>
chip_gen: v7x
topology: tpu7x:2x2x1
jax: 0.10.0
libtpu: 0.0.40
codegen_flags: <defaults>
</compile_context>

<pallas_src>
import functools

import jax
import jax.numpy as jnp
from jax.experimental import pallas as pl
from jax.experimental.pallas import tpu as pltpu


# ---------------------------------------------------------------------------
# Fused global max + mean over the last axis of a (rows, N) array.
# ---------------------------------------------------------------------------
def _pooler_kernel(x_ref, o_ref, accm_ref, accs_ref, *,
                   n_total, ntile, fold_w, needs_mask):
    nidx = pl.program_id(1)
    last = pl.num_programs(1) - 1

    @pl.when(nidx == 0)
    def _init():
        accm_ref[...] = jnp.full(accm_ref.shape, -jnp.inf, accm_ref.dtype)
        accs_ref[...] = jnp.zeros(accs_ref.shape, accs_ref.dtype)

    # Native-dtype tile read; all accumulation in f32.
    x = x_ref[...].astype(jnp.float32)               # (rtile, ntile)
    k = ntile // fold_w

    def fold(xm, xs):
        # Element-wise (VALU) folding of lane-aligned 128-wide chunks into the
        # lane-wide partial accumulators; no per-step XLU reduce, no narrow store.
        pm = accm_ref[...]
        ps = accs_ref[...]
        for j in range(k):                           # static unroll; aligned views
            pm = jnp.maximum(pm, xm[:, j * fold_w:(j + 1) * fold_w])
            ps = ps + xs[:, j * fold_w:(j + 1) * fold_w]
        accm_ref[...] = pm
        accs_ref[...] = ps

    if needs_mask:
        # Only the last N tile pays the iota/compare/select cost.
        @pl.when(nidx == last)
        def _fold_masked():
            rem = n_total - nidx * ntile             # scalar remainder
            lane = jax.lax.broadcasted_iota(jnp.int32, x.shape, 1)
            valid = lane < rem
            fold(jnp.where(valid, x, -jnp.inf), jnp.where(valid, x, 0.0))

        @pl.when(nidx != last)
        def _fold_dense():
            fold(x, x)
    else:
        fold(x, x)

    @pl.when(nidx == last)
    def _finalize():
        m = jnp.max(accm_ref[...], axis=-1, keepdims=True)   # (rtile, 1) XLU, once
        s = jnp.sum(accs_ref[...], axis=-1, keepdims=True)
        o_ref[:, 0:1] = m.astype(o_ref.dtype)
        o_ref[:, 1:2] = (s * (1.0 / n_total)).astype(o_ref.dtype)


@functools.partial(jax.jit, static_argnames=("ntile", "rtile"))
def pooler(x, ntile=None, rtile=None):
    """x: (B, C, N). Returns (B, 2C) = concat([max over N, mean over N], dim=1)."""
    B, C, N = x.shape
    rows = B * C
    xr = x.reshape(rows, N)                          # free: row-major contiguous

    itemsize = jnp.dtype(x.dtype).itemsize
    sub_min = max(8, 32 // itemsize)                 # f32: 8, bf16: 16, int8: 32

    # --- N tiling: single tile when small, 2048-lane (multiple-of-128) chunks. ---
    if ntile is None:
        ntile = N if N <= 4096 else 2048
    needs_mask = (ntile < N) and (N % ntile != 0)
    n_blocks = pl.cdiv(N, ntile)
    fold_w = 128 if ntile % 128 == 0 else ntile

    # --- Row tiling: cap per-block input footprint at ~8 MiB (native dtype). ---
    budget_elems = (8 << 20) // itemsize
    if rtile is None:
        cap = max(sub_min, (budget_elems // ntile) // sub_min * sub_min)
        rtile = rows if rows <= cap else cap
        # Prefer >=2 blocks on the parallel axis so megacore chips use both TCs.
        if pl.cdiv(rows, rtile) < 2 and rows > sub_min:
            half = -(-rows // 2)
            rtile = max(sub_min, -(-half // sub_min) * sub_min)
    row_blocks = pl.cdiv(rows, rtile)

    kernel = functools.partial(_pooler_kernel, n_total=N, ntile=ntile,
                               fold_w=fold_w, needs_mask=needs_mask)

    out = pl.pallas_call(
        kernel,
        out_shape=jax.ShapeDtypeStruct((rows, 2), x.dtype),
        grid=(row_blocks, n_blocks),
        in_specs=[pl.BlockSpec((rtile, ntile), lambda r, n: (r, n))],
        out_specs=pl.BlockSpec((rtile, 2), lambda r, n: (r, 0)),
        scratch_shapes=[pltpu.VMEM((rtile, fold_w), jnp.float32),
                        pltpu.VMEM((rtile, fold_w), jnp.float32)],
        compiler_params=pltpu.CompilerParams(
            dimension_semantics=("parallel", "arbitrary"),
            vmem_limit_bytes=40 << 20),
    )(xr)

    # (B*C, 2) -> (B, C, 2) -> (B, 2, C) -> (B, 2C): [max_0..max_{C-1}, mean_0..].
    # Tiny relayout of B x 2C elements; left to XLA.
    return jnp.transpose(out.reshape(B, C, 2), (0, 2, 1)).reshape(B, 2 * C)


def _pooler_ref(x):
    xf = x.astype(jnp.float32)
    return jnp.concatenate([jnp.max(xf, axis=-1), jnp.mean(xf, axis=-1)], axis=1)


if __name__ == "__main__":
    key = jax.random.PRNGKey(0)

    # Small shape consistent with the module: (batch, channels, length).
    B, C, N = 2, 4, 16
    x = jax.random.normal(key, (B, C, N), dtype=jnp.float32)
    out = pooler(x)
    jax.block_until_ready(out)
    assert out.shape == (B, 2 * C), out.shape
    assert out.dtype == jnp.float32
    assert jnp.allclose(out, _pooler_ref(x), atol=1e-5, rtol=1e-5)

    # Tiled multi-block reduction with a masked tail tile (300 % 128 != 0).
    x2 = jax.random.normal(jax.random.PRNGKey(1), (2, 16, 300), dtype=jnp.float32)
    out2 = pooler(x2, ntile=128)
    jax.block_until_ready(out2)
    assert out2.shape == (2, 32), out2.shape
    assert jnp.allclose(out2, _pooler_ref(x2), atol=1e-5, rtol=1e-5)

    # Native bf16 path: bf16 read straight from HBM, f32 accumulation in-kernel.
    x3 = jax.random.normal(jax.random.PRNGKey(2), (2, 8, 256)).astype(jnp.bfloat16)
    out3 = pooler(x3)
    jax.block_until_ready(out3)
    assert out3.shape == (2, 16), out3.shape
    assert out3.dtype == jnp.bfloat16
    assert jnp.allclose(out3.astype(jnp.float32), _pooler_ref(x3),
                        atol=5e-2, rtol=5e-2)

    print("KERNEL_OK")
</pallas_src>

<mosaic_0001>
module attributes {stable_mosaic.version = 11 : i64} {
  func.func @_pooler_kernel(%arg0: i32, %arg1: i32, %arg2: memref<8x16xf32, #tpu.memory_space<vmem>>, %arg3: memref<8x2xf32, #tpu.memory_space<vmem>>, %arg4: memref<8x16xf32, #tpu.memory_space<vmem>>, %arg5: memref<8x16xf32, #tpu.memory_space<vmem>>) attributes {dimension_semantics = [#tpu.dimension_semantics<parallel>, #tpu.dimension_semantics<arbitrary>], iteration_bounds = array<i64: 1, 1>, scalar_prefetch = 0 : i64, scratch_operands = 2 : i64, tpu.core_type = #tpu.core_type<tc>, window_params = [{transform_indices = @transform_0, window_bounds = array<i64: 8, 16>}, {transform_indices = @transform_1, window_bounds = array<i64: 8, 2>}]} {
    %c0_i32 = arith.constant 0 : i32
    %0 = arith.cmpi eq, %arg1, %c0_i32 : i32
    %1 = arith.extui %0 : i1 to i32
    %c0_i32_0 = arith.constant 0 : i32
    %2 = arith.cmpi ne, %1, %c0_i32_0 : i32
    scf.if %2 {
      %cst = arith.constant 0xFF800000 : f32
      %13 = vector.broadcast %cst : f32 to vector<8x16xf32>
      %c0_12 = arith.constant 0 : index
      %c0_13 = arith.constant 0 : index
      %14 = vector.load %arg4[%c0_12, %c0_13] : memref<8x16xf32, #tpu.memory_space<vmem>>, vector<8x16xf32>
      tpu.vector_store %arg4[%c0_12, %c0_13], %13 {strides = array<i32>} : memref<8x16xf32, #tpu.memory_space<vmem>>, vector<8x16xf32>,
      %cst_14 = arith.constant 0.000000e+00 : f32
      %15 = vector.broadcast %cst_14 : f32 to vector<8x16xf32>
      %c0_15 = arith.constant 0 : index
      %c0_16 = arith.constant 0 : index
      %16 = vector.load %arg5[%c0_15, %c0_16] : memref<8x16xf32, #tpu.memory_space<vmem>>, vector<8x16xf32>
      tpu.vector_store %arg5[%c0_15, %c0_16], %15 {strides = array<i32>} : memref<8x16xf32, #tpu.memory_space<vmem>>, vector<8x16xf32>,
    } else {
    }
    %c0 = arith.constant 0 : index
    %c0_1 = arith.constant 0 : index
    %3 = vector.load %arg2[%c0, %c0_1] : memref<8x16xf32, #tpu.memory_space<vmem>>, vector<8x16xf32>
    %c0_2 = arith.constant 0 : index
    %c0_3 = arith.constant 0 : index
    %4 = vector.load %arg4[%c0_2, %c0_3] : memref<8x16xf32, #tpu.memory_space<vmem>>, vector<8x16xf32>
    %c0_4 = arith.constant 0 : index
    %c0_5 = arith.constant 0 : index
    %5 = vector.load %arg5[%c0_4, %c0_5] : memref<8x16xf32, #tpu.memory_space<vmem>>, vector<8x16xf32>
    %6 = arith.maximumf %4, %3 : vector<8x16xf32>
    %7 = arith.addf %5, %3 : vector<8x16xf32>
    %c0_6 = arith.constant 0 : index
    %c0_7 = arith.constant 0 : index
    %8 = vector.load %arg4[%c0_6, %c0_7] : memref<8x16xf32, #tpu.memory_space<vmem>>, vector<8x16xf32>
    tpu.vector_store %arg4[%c0_6, %c0_7], %6 {strides = array<i32>} : memref<8x16xf32, #tpu.memory_space<vmem>>, vector<8x16xf32>,
    %c0_8 = arith.constant 0 : index
    %c0_9 = arith.constant 0 : index
    %9 = vector.load %arg5[%c0_8, %c0_9] : memref<8x16xf32, #tpu.memory_space<vmem>>, vector<8x16xf32>
    tpu.vector_store %arg5[%c0_8, %c0_9], %7 {strides = array<i32>} : memref<8x16xf32, #tpu.memory_space<vmem>>, vector<8x16xf32>,
    %c0_i32_10 = arith.constant 0 : i32
    %10 = arith.cmpi eq, %arg1, %c0_i32_10 : i32
    %11 = arith.extui %10 : i1 to i32
    %c0_i32_11 = arith.constant 0 : i32
    %12 = arith.cmpi ne, %11, %c0_i32_11 : i32
    scf.if %12 {
      %c0_12 = arith.constant 0 : index
      %c0_13 = arith.constant 0 : index
      %13 = vector.load %arg4[%c0_12, %c0_13] : memref<8x16xf32, #tpu.memory_space<vmem>>, vector<8x16xf32>
      %cst = arith.constant dense<0xFF800000> : vector<8xf32>
      %14 = vector.multi_reduction <maximumf>, %13, %cst [1] : vector<8x16xf32> to vector<8xf32>
      %15 = vector.shape_cast %14 : vector<8xf32> to vector<8x1xf32>
      %c0_14 = arith.constant 0 : index
      %c0_15 = arith.constant 0 : index
      %16 = vector.load %arg5[%c0_14, %c0_15] : memref<8x16xf32, #tpu.memory_space<vmem>>, vector<8x16xf32>
      %cst_16 = arith.constant dense<0.000000e+00> : vector<8xf32>
      %17 = vector.multi_reduction <add>, %16, %cst_16 [1] : vector<8x16xf32> to vector<8xf32>
      %18 = vector.shape_cast %17 : vector<8xf32> to vector<8x1xf32>
      %c0_17 = arith.constant 0 : index
      %c0_18 = arith.constant 0 : index
      %19 = vector.load %arg3[%c0_17, %c0_18] : memref<8x2xf32, #tpu.memory_space<vmem>>, vector<8x1xf32>
      tpu.vector_store %arg3[%c0_17, %c0_18], %15 {strides = array<i32>} : memref<8x2xf32, #tpu.memory_space<vmem>>, vector<8x1xf32>,
      %cst_19 = arith.constant 6.250000e-02 : f32
      %20 = vector.broadcast %cst_19 : f32 to vector<8x1xf32>
      %21 = arith.mulf %18, %20 : vector<8x1xf32>
      %c0_20 = arith.constant 0 : index
      %c1 = arith.constant 1 : index
      %22 = vector.load %arg3[%c0_20, %c1] : memref<8x2xf32, #tpu.memory_space<vmem>>, vector<8x1xf32>
      tpu.vector_store %arg3[%c0_20, %c1], %21 {strides = array<i32>} : memref<8x2xf32, #tpu.memory_space<vmem>>, vector<8x1xf32>,
    } else {
    }
    return
  }
  func.func @transform_0(%arg0: i32, %arg1: i32) -> (i32, i32) {
    %c0_i32 = arith.constant 0 : i32
    return %arg0, %arg1 : i32, i32
  }
  func.func @transform_1(%arg0: i32, %arg1: i32) -> (i32, i32) {
    %c0_i32 = arith.constant 0 : i32
    %c0_i32_0 = arith.constant 0 : i32
    return %arg0, %c0_i32 : i32, i32
  }
}

</mosaic_0001>

<bundles_post_ra>
// kernel: pooler.1
= control target key start
LH: loop header
LB: loop body
LE: loop exit
PB: predicated region body
PF: predicated region fallthrough
CT: control target
= control target key end

     0   :  { %6 = vsyncpa [#allocation5], 0  ;;  %s83_s6 = smov [#allocation4]   ;;  %s120_s0 = inlined_call_operand.hbm [shape: f32[8,16], index: 0, kind: input, shape index: {}]   ;;  %s121_s1 = inlined_call_operand.vmem [shape: f32[8,2], index: 1, kind: output, shape index: {}]  }
   0x1   :  { %s13_s7 = sshll.u32 %s83_s6, 4  ;;  %s59_s10 = scalar_lea.hbm %s120_s0, 128  ;;  %s14_s7 = int_to_ptr.vmem [resolvable:$true] %s13_s7 }
   0x2   :  { %p60_p0 = scmp.ne.s32.totalorder %s120_s0, %s59_s10  ;;  %p63_p1 = scmp.lt.u32.totalorder %s59_s10, %s120_s0 }
   0x4   :  { %p65_p2 = pnand %p63_p1, %p60_p0 }
   0x6   :  { %68 = shalt.err (!%p65_p2)
}
   0x7   :  { %s69_s15 = scalar_lea.vmem %s14_s7, 128  ;;  %p74_p4 = scmp.lt.s32.totalorder %s14_s7, %s14_s7 }
   0x8   :  { %p70_p3 = scmp.ne.s32.totalorder %s14_s7, %s69_s15  ;;  %p75_p5 = scmp.lt.s32.totalorder %s69_s15, %s69_s15 }
   0xa   :  { %p76_p6 = por %p75_p5, %p74_p4 }
   0xc   :  { %p77_p7 = pnand %p76_p6, %p70_p3 }
   0xe   :  { %80 = shalt.err (!%p77_p7)
}
   0xf   :  { %16 = dma.hbm_to_vmem [thread:$0]  %s120_s0, 128, %s14_s7, [#allocation5]  }
  0x10   :  { %81 = dma.done.wait [#allocation5], 128  }
  0x11   :  { %82 = vsyncadd [#allocation5], 4294967168  ;;  %vm24_vm0 = vcmask 130048   ;;  %v84_v0 = vmov 0.0   ;;  %v85_v1 = vmov -inf   ;;  %v27_v2 = vld [vmem:[#allocation4] sm:$0xff] }
  0x12   :  { %26 = vst.msk [vmem:[#allocation3] sm:$0xff] %vm24_vm0, %v84_v0  ;;  %25 = vst.msk [vmem:[#allocation2] sm:$0xff] %vm24_vm0, %v85_v1  ;;  %vm46_vm1 = vcmask 7168   ;;  %vm49_vm2 = vcmask 15368  }
  0x19   :  { %v29_v3 = vld [vmem:[#allocation3] sm:$0xff]  ;;  %v28_v4 = vld [vmem:[#allocation2] sm:$0xff] }
  0x1a   :  { %v31_v5 = vadd.f32 %v29_v3, %v27_v2  ;;  %v30_v6 = vmax.f32 %v28_v4, %v27_v2 }
  0x1c   :  { %34 = vst.msk [vmem:[#allocation3] sm:$0xff] %vm24_vm0, %v31_v5  ;;  %33 = vst.msk [vmem:[#allocation2] sm:$0xff] %vm24_vm0, %v30_v6 }
  0x23   :  { %v42_v7 = vld [vmem:[#allocation3] sm:$0xff]  ;;  %v38_v8 = vld [vmem:[#allocation2] sm:$0xff] }
  0x24   :  { %v43_v9 = vsel %vm24_vm0, %v42_v7, 0.0  ;;  %v39_v10 = vsel %vm24_vm0, %v38_v8, -inf }
  0x25   :  { %44 = vadd.xlane.f32.xlu0 %v43_v9 }
  0x29   :  { %40 = vmax.xlane.f32.xlu0 %v39_v10 }
  0xb2   :  { %v45_v11 = vpop.xlane.xlu0 %44 }
  0xb3   :  { %v48_v12 = vmul.f32 0.0625, %v45_v11 }
  0xb6   :  { %v41_v13 = vpop.xlane.xlu0 %40 }
  0xb7   :  { %47 = vst.msk [vmem:[%s121_s1] sm:$0xff] %vm46_vm1, %v41_v13 }
  0xb8   :  { %50 = vst.msk [vmem:[%s121_s1] sm:$0xff] %vm49_vm2, %v48_v12 }
  0xb9   :  { %55 = vsyncpa [#allocation5], 1 }

</bundles_post_ra>
